<compile_context>
chip_gen: v7x
topology: tpu7x:2x2x1
jax: 0.10.0
libtpu: 0.0.40
codegen_flags: <defaults>
</compile_context>

<pallas_src>
import math
import functools

import jax
import jax.numpy as jnp
from jax.experimental import pallas as pl
from jax.experimental.pallas import tpu as pltpu


# ----------------------------------------------------------------------------
# Fused kernel: one grid step == one batch element, channel-major layout.
#   lens_ref : SMEM (B,) int32   valid key length per batch (scalar prefetch)
#   x_ref    : (C, T)            activations (as Conv1d sees them)
#   wqkv_ref : (3C, C)  bf16     QKV weight (softmax scale folded into q rows)
#   bqkv_ref : (3C, 1)  f32      QKV bias   (softmax scale folded into q rows)
#   wout_ref : (C, C)   bf16     output-projection weight
#   bout_ref : (C, 1)   f32      output-projection bias
#   o_ref    : (C, T)            output
#   qkv_ref  : (3C, T)  f32      scratch: projected q|k|v (head slices = sublane slices)
#   ocat_ref : (C, T)   f32      scratch: concatenated per-head attention outputs
# ----------------------------------------------------------------------------
def _fused_mha_kernel(lens_ref, x_ref, wqkv_ref, bqkv_ref, wout_ref, bout_ref,
                      o_ref, qkv_ref, ocat_ref, *, n_heads):
    C, T = x_ref.shape
    Dh = C // n_heads
    b = pl.program_id(0)
    length = lens_ref[b]

    # QKV projection (1x1 conv == channel matmul): (3C, C) @ (C, T) -> (3C, T).
    x = x_ref[...].astype(jnp.bfloat16)
    qkv_ref[...] = jnp.dot(wqkv_ref[...], x,
                           preferred_element_type=jnp.float32) + bqkv_ref[...]

    # Key-padding mask built in-kernel (lane axis == key position); exact
    # masked_fill(mask == 0, -10000.0) semantics.
    key_col = jax.lax.broadcasted_iota(jnp.int32, (T, T), 1)
    key_valid = key_col < length

    @pl.loop(0, n_heads)
    def _head(h):
        lo = pl.multiple_of(h * Dh, Dh)
        q = qkv_ref[pl.ds(lo, Dh), :].astype(jnp.bfloat16)            # (Dh, T)
        k = qkv_ref[pl.ds(C + lo, Dh), :].astype(jnp.bfloat16)        # (Dh, T)
        v = qkv_ref[pl.ds(2 * C + lo, Dh), :].astype(jnp.bfloat16)    # (Dh, T)

        # s[tq, tk] = sum_d q[d, tq] * k[d, tk]  (scale already folded into q)
        s = jax.lax.dot_general(q, k, (((0,), (0,)), ((), ())),
                                preferred_element_type=jnp.float32)   # (T, T)
        s = jnp.where(key_valid, s, jnp.float32(-10000.0))
        s = s - jnp.max(s, axis=-1, keepdims=True)
        p = jnp.exp(s)
        inv_denom = pl.reciprocal(jnp.sum(p, axis=-1, keepdims=True), approx=True)
        p = p * inv_denom
        # TODO(synk): nn.Dropout on attention probabilities is identity at inference.

        # o_h[d, tq] = sum_tk v[d, tk] * p[tq, tk]  -> (Dh, T); written into the
        # concat buffer at a sublane offset (no cross-lane work).
        o_h = jax.lax.dot_general(v, p.astype(jnp.bfloat16),
                                  (((1,), (1,)), ((), ())),
                                  preferred_element_type=jnp.float32)
        ocat_ref[pl.ds(lo, Dh), :] = o_h

    # Output projection (1x1 conv): one full-C-contraction MXU matmul.
    out = jnp.dot(wout_ref[...], ocat_ref[...].astype(jnp.bfloat16),
                  preferred_element_type=jnp.float32) + bout_ref[...]
    o_ref[...] = out.astype(o_ref.dtype)


# ----------------------------------------------------------------------------
# One-time parameter prep: fold softmax scale into q rows, cast MXU weights to
# bf16 (biases stay f32; they are added after f32 accumulation).
# Torch layout: Conv1d weight (Cout, Cin, 1) -> stored squeezed as (Cout, Cin).
# ----------------------------------------------------------------------------
def prepare_params(raw, n_heads):
    C = raw["w_out"].shape[0]
    Dh = C // n_heads
    scale = 1.0 / math.sqrt(Dh)
    row_scale = jnp.concatenate(
        [jnp.full((C, 1), scale, jnp.float32), jnp.ones((2 * C, 1), jnp.float32)],
        axis=0)                                                   # (3C, 1)
    return {
        "w_qkv": (raw["w_qkv"] * row_scale).astype(jnp.bfloat16),  # (3C, C)
        "b_qkv": raw["b_qkv"] * row_scale,                         # (3C, 1) f32
        "w_out": raw["w_out"].astype(jnp.bfloat16),                # (C, C)
        "b_out": raw["b_out"],                                     # (C, 1) f32
    }


# ----------------------------------------------------------------------------
# Module-level forward. x: (B, C, T); lengths: (B,) valid key length per batch
# (equivalent to a (B,1,T,T) key-padding mask with mask[b,0,:,tk] = tk < len_b).
# ----------------------------------------------------------------------------
def multi_head_attention(x_bct, lengths, params, n_heads):
    B, C, T = x_bct.shape
    assert C % n_heads == 0

    kern = functools.partial(_fused_mha_kernel, n_heads=n_heads)
    grid_spec = pltpu.PrefetchScalarGridSpec(
        num_scalar_prefetch=1,
        grid=(B,),
        in_specs=[
            pl.BlockSpec((None, C, T), lambda b, lens: (b, 0, 0)),   # x, per batch
            pl.BlockSpec((3 * C, C), lambda b, lens: (0, 0)),        # w_qkv resident
            pl.BlockSpec((3 * C, 1), lambda b, lens: (0, 0)),        # b_qkv resident
            pl.BlockSpec((C, C), lambda b, lens: (0, 0)),            # w_out resident
            pl.BlockSpec((C, 1), lambda b, lens: (0, 0)),            # b_out resident
        ],
        out_specs=pl.BlockSpec((None, C, T), lambda b, lens: (b, 0, 0)),
        scratch_shapes=[
            pltpu.VMEM((3 * C, T), jnp.float32),   # qkv (sublane head slices)
            pltpu.VMEM((C, T), jnp.float32),       # concat of per-head outputs
        ],
    )
    return pl.pallas_call(
        kern,
        out_shape=jax.ShapeDtypeStruct((B, C, T), x_bct.dtype),
        grid_spec=grid_spec,
        compiler_params=pltpu.CompilerParams(
            dimension_semantics=("parallel",),
            vmem_limit_bytes=48 * 1024 * 1024),
    )(lengths.astype(jnp.int32), x_bct, params["w_qkv"], params["b_qkv"],
      params["w_out"], params["b_out"])


# ----------------------------------------------------------------------------
# Pure-JAX reference (mirrors the PyTorch forward exactly, eval-mode dropout),
# using the raw f32 parameters and a dense (B,1,T,T) mask.
# ----------------------------------------------------------------------------
def reference_mha(x_bct, mask, raw, n_heads):
    B, C, T = x_bct.shape
    H = n_heads
    Dh = C // H
    scale = 1.0 / math.sqrt(Dh)
    qkv = jnp.einsum("oc,bct->bot", raw["w_qkv"], x_bct) + raw["b_qkv"][None]
    qkv = qkv.reshape(B, 3, H, Dh, T)
    q = jnp.swapaxes(qkv[:, 0], -1, -2)          # (B, H, T, Dh)
    k = jnp.swapaxes(qkv[:, 1], -1, -2)
    v = jnp.swapaxes(qkv[:, 2], -1, -2)
    score = jnp.einsum("bhtd,bhsd->bhts", q, k) * scale
    score = jnp.where(mask == 0, -10000.0, score)
    p = jax.nn.softmax(score, axis=-1)
    o = jnp.einsum("bhts,bhsd->bhtd", p, v)
    o = jnp.swapaxes(o, -1, -2).reshape(B, C, T)
    out = jnp.einsum("oc,bct->bot", raw["w_out"], o) + raw["b_out"][None]
    return out


if __name__ == "__main__":
    # Small shapes: channels=32, n_heads=4 (head dim 8), batch=2, seq T=16.
    B, C, T, H = 2, 32, 16, 4

    key = jax.random.PRNGKey(0)
    k1, k2, k3, k4, kx = jax.random.split(key, 5)

    raw = {
        "w_qkv": jax.random.normal(k1, (3 * C, C), jnp.float32) * 0.1,
        "b_qkv": jax.random.normal(k2, (3 * C, 1), jnp.float32) * 0.1,
        "w_out": jax.random.normal(k3, (C, C), jnp.float32) * 0.1,
        "b_out": jax.random.normal(k4, (C, 1), jnp.float32) * 0.1,
    }
    x = jax.random.normal(kx, (B, C, T), jnp.float32)          # (B, C, T)
    lengths = jnp.array([T, T - 6], jnp.int32)                 # valid key lengths

    params = prepare_params(raw, H)
    out = multi_head_attention(x, lengths, params, H)
    out = jax.block_until_ready(out)

    # Dense (B,1,T,T) key-padding mask for the reference (0 => masked out).
    key_valid = (jnp.arange(T)[None, :] < lengths[:, None]).astype(jnp.float32)  # (B, T)
    mask = jnp.broadcast_to(key_valid[:, None, None, :], (B, 1, T, T))
    ref = reference_mha(x, mask, raw, H)

    assert out.shape == (B, C, T)
    # bf16 MXU operands + approx reciprocal => loosened tolerance vs f32 reference.
    assert jnp.allclose(out, ref, atol=5e-2, rtol=5e-2), (
        f"mismatch vs reference, max abs err {jnp.max(jnp.abs(out - ref))}")

    print("KERNEL_OK")
</pallas_src>

<mosaic_0001>
module attributes {stable_mosaic.version = 11 : i64} {
  func.func @_fused_mha_kernel(%arg0: i32, %arg1: memref<2xi32, #tpu.memory_space<smem>>, %arg2: memref<1x32x16xf32, #tpu.memory_space<vmem>>, %arg3: memref<96x32xbf16, #tpu.memory_space<vmem>>, %arg4: memref<96x1xf32, #tpu.memory_space<vmem>>, %arg5: memref<32x32xbf16, #tpu.memory_space<vmem>>, %arg6: memref<32x1xf32, #tpu.memory_space<vmem>>, %arg7: memref<1x32x16xf32, #tpu.memory_space<vmem>>, %arg8: memref<96x16xf32, #tpu.memory_space<vmem>>, %arg9: memref<32x16xf32, #tpu.memory_space<vmem>>) attributes {dimension_semantics = [#tpu.dimension_semantics<parallel>], iteration_bounds = array<i64: 2>, scalar_prefetch = 1 : i64, scratch_operands = 2 : i64, tpu.core_type = #tpu.core_type<tc>, window_params = [{transform_indices = @transform_0, window_bounds = array<i64: 1, 32, 16>}, {pipeline_mode = #tpu.pipeline_mode<synchronous>, transform_indices = @transform_1, window_bounds = array<i64: 96, 32>}, {pipeline_mode = #tpu.pipeline_mode<synchronous>, transform_indices = @transform_2, window_bounds = array<i64: 96, 1>}, {pipeline_mode = #tpu.pipeline_mode<synchronous>, transform_indices = @transform_3, window_bounds = array<i64: 32, 32>}, {pipeline_mode = #tpu.pipeline_mode<synchronous>, transform_indices = @transform_4, window_bounds = array<i64: 32, 1>}, {transform_indices = @transform_5, window_bounds = array<i64: 1, 32, 16>}]} {
    %0 = arith.index_cast %arg0 : i32 to index
    %1 = memref.load %arg1[%0] : memref<2xi32, #tpu.memory_space<smem>>
    %c0 = arith.constant 0 : index
    %c0_0 = arith.constant 0 : index
    %c0_1 = arith.constant 0 : index
    %2 = vector.load %arg2[%c0, %c0_0, %c0_1] : memref<1x32x16xf32, #tpu.memory_space<vmem>>, vector<1x32x16xf32>
    %3 = vector.shape_cast %2 : vector<1x32x16xf32> to vector<32x16xf32>
    %4 = arith.truncf %3 : vector<32x16xf32> to vector<32x16xbf16>
    %c0_2 = arith.constant 0 : index
    %c0_3 = arith.constant 0 : index
    %5 = vector.load %arg3[%c0_2, %c0_3] : memref<96x32xbf16, #tpu.memory_space<vmem>>, vector<96x32xbf16>
    %cst = arith.constant dense<0.000000e+00> : vector<96x16xf32>
    %6 = tpu.matmul %5, %4, %cst {dimension_numbers = #tpu.dot_dimension_numbers<[1], [0], [0], [1], [0, 0, 1, 1], [], []>} : vector<96x32xbf16>, vector<32x16xbf16>, vector<96x16xf32> -> vector<96x16xf32>
    %c0_4 = arith.constant 0 : index
    %c0_5 = arith.constant 0 : index
    %7 = vector.load %arg4[%c0_4, %c0_5] : memref<96x1xf32, #tpu.memory_space<vmem>>, vector<96x1xf32>
    %8 = vector.broadcast %7 : vector<96x1xf32> to vector<96x16xf32>
    %9 = arith.addf %6, %8 : vector<96x16xf32>
    %c0_6 = arith.constant 0 : index
    %c0_7 = arith.constant 0 : index
    %10 = vector.load %arg8[%c0_6, %c0_7] : memref<96x16xf32, #tpu.memory_space<vmem>>, vector<96x16xf32>
    tpu.vector_store %arg8[%c0_6, %c0_7], %9 {strides = array<i32>} : memref<96x16xf32, #tpu.memory_space<vmem>>, vector<96x16xf32>,
    %11 = tpu.iota {dimensions = array<i32: 1>} : vector<16x16xi32>
    %12 = vector.broadcast %1 : i32 to vector<16x16xi32>
    %13 = arith.cmpi slt, %11, %12 : vector<16x16xi32>
    %c0_i32 = arith.constant 0 : i32
    %c4_i32 = arith.constant 4 : i32
    %14 = arith.addi %c0_i32, %c4_i32 : i32
    %c1_i32 = arith.constant 1 : i32
    scf.for %arg10 = %c0_i32 to %14 step %c1_i32  : i32 {
      %c1_i32_19 = arith.constant 1 : i32
      %25 = arith.muli %arg10, %c1_i32_19 : i32
      %c0_i32_20 = arith.constant 0 : i32
      %26 = arith.addi %c0_i32_20, %25 : i32
      %c8_i32 = arith.constant 8 : i32
      %27 = arith.muli %26, %c8_i32 : i32
      %28 = tpu.assume_multiple %27, 8 : i32
      %29 = arith.index_cast %28 : i32 to index
      %c0_21 = arith.constant 0 : index
      %30 = vector.load %arg8[%29, %c0_21] : memref<96x16xf32, #tpu.memory_space<vmem>>, vector<8x16xf32>
      %31 = arith.truncf %30 : vector<8x16xf32> to vector<8x16xbf16>
      %c32_i32 = arith.constant 32 : i32
      %32 = arith.addi %c32_i32, %28 : i32
      %33 = arith.index_cast %32 : i32 to index
      %c0_22 = arith.constant 0 : index
      %34 = vector.load %arg8[%33, %c0_22] : memref<96x16xf32, #tpu.memory_space<vmem>>, vector<8x16xf32>
      %35 = arith.truncf %34 : vector<8x16xf32> to vector<8x16xbf16>
      %c64_i32 = arith.constant 64 : i32
      %36 = arith.addi %c64_i32, %28 : i32
      %37 = arith.index_cast %36 : i32 to index
      %c0_23 = arith.constant 0 : index
      %38 = vector.load %arg8[%37, %c0_23] : memref<96x16xf32, #tpu.memory_space<vmem>>, vector<8x16xf32>
      %39 = arith.truncf %38 : vector<8x16xf32> to vector<8x16xbf16>
      %cst_24 = arith.constant dense<0.000000e+00> : vector<16x16xf32>
      %40 = tpu.matmul %31, %35, %cst_24 {dimension_numbers = #tpu.dot_dimension_numbers<[0], [0], [1], [1], [0, 1, 1, 1], [], []>} : vector<8x16xbf16>, vector<8x16xbf16>, vector<16x16xf32> -> vector<16x16xf32>
      %cst_25 = arith.constant -1.000000e+04 : f32
      %41 = vector.broadcast %cst_25 : f32 to vector<16x16xf32>
      %42 = arith.select %13, %40, %41 : vector<16x16xi1>, vector<16x16xf32>
      %cst_26 = arith.constant dense<0xFF800000> : vector<16xf32>
      %43 = vector.multi_reduction <maximumf>, %42, %cst_26 [1] : vector<16x16xf32> to vector<16xf32>
      %44 = vector.shape_cast %43 : vector<16xf32> to vector<16x1xf32>
      %45 = vector.broadcast %44 : vector<16x1xf32> to vector<16x16xf32>
      %46 = arith.subf %42, %45 : vector<16x16xf32>
      %47 = math.exp %46 : vector<16x16xf32>
      %cst_27 = arith.constant dense<0.000000e+00> : vector<16xf32>
      %48 = vector.multi_reduction <add>, %47, %cst_27 [1] : vector<16x16xf32> to vector<16xf32>
      %49 = vector.shape_cast %48 : vector<16xf32> to vector<16x1xf32>
      %50 = tpu.reciprocal %49 {approx = true} : vector<16x1xf32> -> vector<16x1xf32>
      %51 = vector.broadcast %50 : vector<16x1xf32> to vector<16x16xf32>
      %52 = arith.mulf %47, %51 : vector<16x16xf32>
      %53 = arith.truncf %52 : vector<16x16xf32> to vector<16x16xbf16>
      %cst_28 = arith.constant dense<0.000000e+00> : vector<8x16xf32>
      %54 = tpu.matmul %39, %53, %cst_28 {dimension_numbers = #tpu.dot_dimension_numbers<[1], [1], [0], [0], [0, 0, 1, 0], [], []>} : vector<8x16xbf16>, vector<16x16xbf16>, vector<8x16xf32> -> vector<8x16xf32>
      %55 = arith.index_cast %28 : i32 to index
      %c0_29 = arith.constant 0 : index
      %56 = vector.load %arg9[%55, %c0_29] : memref<32x16xf32, #tpu.memory_space<vmem>>, vector<8x16xf32>
      tpu.vector_store %arg9[%55, %c0_29], %54 {strides = array<i32>} : memref<32x16xf32, #tpu.memory_space<vmem>>, vector<8x16xf32>,
    }
    %c4_i32_8 = arith.constant 4 : i32
    %c0_9 = arith.constant 0 : index
    %c0_10 = arith.constant 0 : index
    %15 = vector.load %arg5[%c0_9, %c0_10] : memref<32x32xbf16, #tpu.memory_space<vmem>>, vector<32x32xbf16>
    %c0_11 = arith.constant 0 : index
    %c0_12 = arith.constant 0 : index
    %16 = vector.load %arg9[%c0_11, %c0_12] : memref<32x16xf32, #tpu.memory_space<vmem>>, vector<32x16xf32>
    %17 = arith.truncf %16 : vector<32x16xf32> to vector<32x16xbf16>
    %cst_13 = arith.constant dense<0.000000e+00> : vector<32x16xf32>
    %18 = tpu.matmul %15, %17, %cst_13 {dimension_numbers = #tpu.dot_dimension_numbers<[1], [0], [0], [1], [0, 0, 1, 1], [], []>} : vector<32x32xbf16>, vector<32x16xbf16>, vector<32x16xf32> -> vector<32x16xf32>
    %c0_14 = arith.constant 0 : index
    %c0_15 = arith.constant 0 : index
    %19 = vector.load %arg6[%c0_14, %c0_15] : memref<32x1xf32, #tpu.memory_space<vmem>>, vector<32x1xf32>
    %20 = vector.broadcast %19 : vector<32x1xf32> to vector<32x16xf32>
    %21 = arith.addf %18, %20 : vector<32x16xf32>
    %c0_16 = arith.constant 0 : index
    %c0_17 = arith.constant 0 : index
    %c0_18 = arith.constant 0 : index
    %22 = vector.load %arg7[%c0_16, %c0_17, %c0_18] : memref<1x32x16xf32, #tpu.memory_space<vmem>>, vector<1x32x16xf32>
    %23 = vector.shape_cast %22 : vector<1x32x16xf32> to vector<32x16xf32>
    %24 = vector.shape_cast %21 : vector<32x16xf32> to vector<1x32x16xf32>
    tpu.vector_store %arg7[%c0_16, %c0_17, %c0_18], %24 {strides = array<i32>} : memref<1x32x16xf32, #tpu.memory_space<vmem>>, vector<1x32x16xf32>,
    return
  }
  func.func @transform_0(%arg0: i32, %arg1: memref<2xi32, #tpu.memory_space<smem>>) -> (i32, i32, i32) {
    %c0_i32 = arith.constant 0 : i32
    %c0_i32_0 = arith.constant 0 : i32
    %c0_i32_1 = arith.constant 0 : i32
    return %arg0, %c0_i32, %c0_i32_0 : i32, i32, i32
  }
  func.func @transform_1(%arg0: i32, %arg1: memref<2xi32, #tpu.memory_space<smem>>) -> (i32, i32) {
    %c0_i32 = arith.constant 0 : i32
    %c0_i32_0 = arith.constant 0 : i32
    %c0_i32_1 = arith.constant 0 : i32
    return %c0_i32, %c0_i32_0 : i32, i32
  }
  func.func @transform_2(%arg0: i32, %arg1: memref<2xi32, #tpu.memory_space<smem>>) -> (i32, i32) {
    %c0_i32 = arith.constant 0 : i32
    %c0_i32_0 = arith.constant 0 : i32
    %c0_i32_1 = arith.constant 0 : i32
    return %c0_i32, %c0_i32_0 : i32, i32
  }
  func.func @transform_3(%arg0: i32, %arg1: memref<2xi32, #tpu.memory_space<smem>>) -> (i32, i32) {
    %c0_i32 = arith.constant 0 : i32
    %c0_i32_0 = arith.constant 0 : i32
    %c0_i32_1 = arith.constant 0 : i32
    return %c0_i32, %c0_i32_0 : i32, i32
  }
  func.func @transform_4(%arg0: i32, %arg1: memref<2xi32, #tpu.memory_space<smem>>) -> (i32, i32) {
    %c0_i32 = arith.constant 0 : i32
    %c0_i32_0 = arith.constant 0 : i32
    %c0_i32_1 = arith.constant 0 : i32
    return %c0_i32, %c0_i32_0 : i32, i32
  }
  func.func @transform_5(%arg0: i32, %arg1: memref<2xi32, #tpu.memory_space<smem>>) -> (i32, i32, i32) {
    %c0_i32 = arith.constant 0 : i32
    %c0_i32_0 = arith.constant 0 : i32
    %c0_i32_1 = arith.constant 0 : i32
    return %arg0, %c0_i32, %c0_i32_0 : i32, i32, i32
  }
}

</mosaic_0001>

<bundles_post_ra>
// kernel: tpu_custom_call.1
= control target key start
LH: loop header
LB: loop body
LE: loop exit
PB: predicated region body
PF: predicated region fallthrough
CT: control target
= control target key end

     0   :  { %s1166_s0 = inlined_call_operand.vmem [shape: s32[2], index: 0, kind: input, shape index: {}]   ;;  %s1167_s1 = inlined_call_operand.vmem [shape: f32[2,32,16], index: 1, kind: input, shape index: {}]   ;;  %s1168_s2 = inlined_call_operand.vmem [shape: bf16[96,32], index: 2, kind: input, shape index: {}]   ;;  %s1169_s3 = inlined_call_operand.vmem [shape: f32[96,1], index: 3, kind: input, shape index: {}]   ;;  %s1170_s4 = inlined_call_operand.vmem [shape: bf16[32,32], index: 4, kind: input, shape index: {}]   ;;  %s1171_s5 = inlined_call_operand.vmem [shape: f32[32,1], index: 5, kind: input, shape index: {}]   ;;  %s1172_s6 = inlined_call_operand.vmem [shape: f32[2,32,16], index: 6, kind: output, shape index: {}]  }
   0x1   :  { %s11_s23 = sshll.u32 %s1166_s0, 4  ;;  %s12_s23 = int_to_ptr.vmem [resolvable:$true] %s11_s23 }
   0x2   :  { %s933_s24 = scalar_lea.vmem %s12_s23, 16  ;;  %p938_p1 = scmp.lt.s32.totalorder %s12_s23, %s12_s23 }
   0x3   :  { %p934_p0 = scmp.ne.s32.totalorder %s12_s23, %s933_s24  ;;  %p939_p2 = scmp.lt.s32.totalorder %s933_s24, %s933_s24 }
   0x5   :  { %p940_p3 = por %p939_p2, %p938_p1 }
   0x7   :  { %p941_p4 = pnand %p940_p3, %p934_p0 }
   0x9   :  { %944 = shalt.err (!%p941_p4)  }
   0xa   :  { %s963_s25 = smov [#allocation5]  }
   0xb   :  { %14 = dma.vmem_to_smem %s12_s23, 16, %s963_s25, [#allocation4] }
   0xc   :  { %953 = dma.done.wait [#allocation4], 16 }
   0xd   :  { %954 = vsyncadd [#allocation4], 4294967280 }
   0xe   :  { %16 = sfence }
   0xf   :  { %s1005_s26 = smov 0  }
  0x10 LB: > { %s1011_s0 = sadd.s32 4294967295, %s957_s26   ;;  %p804_p5 = scmp.ge.s32.totalorder %s957_s26, 1  ;;  %s957_s26 = sphi %s1005_s26, %s22_s26  }
  0x11   : > { %p194_p6 = scmp.lt.s32.totalorder %s957_s26, 3 }
  0x13   : > { %p195_p7 = pnand %p804_p5, %p194_p6 }
  0x14   : > { %p222_p8 = scmp.lt.s32.totalorder (!%p195_p7), %s1011_s0, 1  ;;  %v915_v0 = vld [vmem:[%s1168_s2] sm:$0xff] (!%p195_p7)   ;;  %vm354_vm0 = vcmask (!%p195_p7), 261120   ;;  %v916_v1 = vld [vmem:[%s1168_s2 + $0x10] sm:$0xff] (!%p195_p7)   ;;  %v964_v2 = vmov (!%p195_p7), 0   ;;  %v255_v11 = vld [vmem:[%s1169_s3 + $0x18] sm:$0xff] (!%p195_p7)  ;;  %v467_v25 = vlaneseq (!%p195_p7) }
  0x15   : > { %198 = sbr.rel (%p195_p7) target bundleno = 1370 (0x55a), region = 40  ;;  %856 = vmatprep.mubr.msk.bf16.mxu0 (!%p195_p7), %vm354_vm0, %v915_v0  ;;  %860 = vmatprep.mubr.msk.bf16.mxu1 (!%p195_p7), %vm354_vm0, %v916_v1  ;;  %v254_v8 = vld [vmem:[%s1169_s3 + $0x10] sm:$0xff] (!%p195_p7)  ;;  %v252_v10 = vld [vmem:[%s1169_s3] sm:$0xff] (!%p195_p7)  ;;  %v917_v12 = vld [vmem:[%s1168_s2 + $0x8] sm:$0xff] (!%p195_p7)   ;;  %s233_s25 = sld [smem:[#allocation5 + %s1011_s0]] (!%p195_p7)  ;;  %vm454_vm2 = vcmask (!%p195_p7), 130048  }
  0x16   : > { %914 = vset.pattern.permute.xlu1 (!%p195_p7), %v964_v2  ;;  %913 = vset.pattern.permute.xlu0 (!%p195_p7), %v964_v2  ;;  %v918_v13 = vld [vmem:[%s1168_s2 + $0x18] sm:$0xff] (!%p195_p7)   ;;  %v253_v14 = vld [vmem:[%s1169_s3 + $0x8] sm:$0xff] (!%p195_p7)  ;;  %v919_v16 = vld [vmem:[%s1168_s2 + $0x20] sm:$0xff] (!%p195_p7)   ;;  %v468_v26 = vand.u32 (!%p195_p7), 127, %v467_v25 }
  0x17   : > { %276 = vperm.xlu1 (!%p195_p7), %914, %v254_v8   ;;  %266 = vperm.xlu0 (!%p195_p7), %913, %v252_v10   ;;  %v257_v15 = vld [vmem:[%s1169_s3 + $0x28] sm:$0xff] (!%p195_p7)  ;;  %v256_v17 = vld [vmem:[%s1169_s3 + $0x20] sm:$0xff] (!%p195_p7)  ;;  %v259_v18 = vld [vmem:[%s1169_s3 + $0x38] sm:$0xff] (!%p195_p7) }
  0x18   : > { %v920_v19 = vld [vmem:[%s1168_s2 + $0x28] sm:$0xff] (!%p195_p7)   ;;  %v258_v20 = vld [vmem:[%s1169_s3 + $0x30] sm:$0xff] (!%p195_p7)  ;;  %v260_v22 = vld [vmem:[%s1169_s3 + $0x40] sm:$0xff] (!%p195_p7) }
  0x19   : > { %v261_v21 = vld [vmem:[%s1169_s3 + $0x48] sm:$0xff] (!%p195_p7)  ;;  %v263_v23 = vld [vmem:[%s1169_s3 + $0x58] sm:$0xff] (!%p195_p7)  ;;  %v262_v24 = vld [vmem:[%s1169_s3 + $0x50] sm:$0xff] (!%p195_p7) }
  0x1b   : > { %281 = vperm.xlu1 (!%p195_p7), %914, %v255_v11   ;;  %271 = vperm.xlu0 (!%p195_p7), %913, %v253_v14   ;;  %v469_v27 = vstv (!%p195_p7), %s233_s25 }
  0x1c   : > { %s223_s29 = scalar_select %p222_p8, %s1011_s0, 1  ;;  %vm1088_vm1 = vcmp.lt.s32.totalorder %v468_v26, %v469_v27 }
  0x1d   : > { %s1104_s0 = smov 0  }
  0x1e   : > { %s834_s8 = sshll.u32 %s223_s29, 5 }
  0x1f   : > { %s226_s11 = scalar_lea.vmem %s1167_s1, %s834_s8  ;;  %s1032_s14 = scalar_lea.vmem %s1172_s6, %s834_s8  ;;  %291 = vperm.xlu1 %914, %v257_v15   ;;  %286 = vperm.xlu0 %913, %v256_v17  }
  0x20   : > { %v234_v3 = vld [vmem:[%s226_s11] sm:$0xff]  ;;  %v235_v4 = vld [vmem:[%s226_s11 + $0x8] sm:$0xff]  ;;  %v236_v5 = vld [vmem:[%s226_s11 + $0x10] sm:$0xff] }
  0x21   : > { %v238_v6 = vpack.c.bf16 %v235_v4, %v234_v3  ;;  %v237_v7 = vld [vmem:[%s226_s11 + $0x18] sm:$0xff] }
  0x22   : > { %v239_v9 = vpack.c.bf16 %v237_v7, %v236_v5 }
  0x23   : > { %852 = vmatprep.subr.bf16.mxu0 %v238_v6  ;;  %888 = vmatprep.subr.bf16.mxu1 %v238_v6 }
  0x24   : > { %853 = vmatpush3.bf16.msra.mxu0 %v238_v6  ;;  %890 = vmatpush3.bf16.msra.mxu1 %v238_v6 }
  0x25   : > { %854 = vmatprep.subr.bf16.mxu0 %v239_v9  ;;  %889 = vmatprep.subr.bf16.mxu1 %v239_v9 }
  0x26   : > { %301 = vperm.xlu1 %914, %v259_v18   ;;  %296 = vperm.xlu0 %913, %v258_v20  }
  0x28   : > { %855 = vmatpush3.bf16.msra.mxu0 %v239_v9  ;;  %891 = vmatpush3.bf16.msra.mxu1 %v239_v9 }
  0x2a   : > { %311 = vperm.xlu1 %914, %v261_v21   ;;  %306 = vperm.xlu0 %913, %v260_v22  }
  0x2b   : > { %857 = vmatmul.mubr.msk.bf16.vlgmr.msra.gmra.mrb[0].mxu0 %vm354_vm0, %v917_v12  ;;  %861 = vmatmul.mubr.msk.bf16.vlgmr.msra.gmra.mrb[0].mxu1 %vm354_vm0, %v918_v13 }
  0x2c   : > { %864 = vmatprep.mubr.msk.bf16.mxu1 %vm354_vm0, %v919_v16 }
  0x2e   : > { %321 = vperm.xlu1 %914, %v263_v23   ;;  %316 = vperm.xlu0 %913, %v262_v24  }
  0x33   : > { %865 = vmatmul.mubr.msk.bf16.gmra.mrb[4].mxu1 %vm354_vm0, %v920_v19 }
  0x96   : > { %v267_v29 = vpop.permute.xlu0 %266  ;;  %v277_v30 = vpop.permute.xlu1 %276 }
  0x9a   : > { %v272_v31 = vpop.permute.xlu0 %271  ;;  %v282_v32 = vpop.permute.xlu1 %281 }
  0x9e   : > { %v287_v33 = vpop.permute.xlu0 %286  ;;  %v292_v34 = vpop.permute.xlu1 %291 }
  0xa5   : > { %v297_v35 = vpop.permute.xlu0 %296  ;;  %v302_v36 = vpop.permute.xlu1 %301 }
  0xa9   : > { %v307_v37 = vpop.permute.xlu0 %306  ;;  %v312_v52 = vpop.permute.xlu1 %311 }
  0xad   : > { %v317_v55 = vpop.permute.xlu0 %316  ;;  %v322_v59 = vpop.permute.xlu1 %321 }
  0xfe   : > { %v858_v38 = vpop.f32.mrb[0].mxu0  ;;  %v862_v39 = vpop.f32.mrb[0].mxu1 }
  0xff   : > { %v416_v40 = vadd.f32 %v858_v38, %v277_v30  ;;  %v432_v41 = vadd.f32 %v862_v39, %v297_v35  ;;  %v407_v42 = vpop.f32.mrb[1].mxu0  ;;  %v423_v43 = vpop.f32.mrb[1].mxu1 }
 0x100   : > { %v408_v44 = vadd.f32 %v407_v42, %v267_v29  ;;  %v424_v45 = vadd.f32 %v423_v43, %v287_v33  ;;  %v859_v46 = vpop.f32.mrb[2].mxu0  ;;  %v863_v47 = vpop.f32.mrb[2].mxu1 }
 0x101   : > { %457 = vst.msk [vmem:[#allocation2 + $0x10] sm:$0xff] %vm454_vm2, %v416_v40  ;;  %461 = vst.msk [vmem:[#allocation2 + $0x30] sm:$0xff] %vm454_vm2, %v432_v41  ;;  %v419_v48 = vadd.f32 %v859_v46, %v282_v32  ;;  %v435_v49 = vadd.f32 %v863_v47, %v302_v36  ;;  %v410_v50 = vpop.f32.mrb[3].mxu0  ;;  %v426_v51 = vpop.f32.mrb[3].mxu1 }
 0x102   : > { %455 = vst.msk [vmem:[#allocation2] sm:$0xff] %vm454_vm2, %v408_v44  ;;  %459 = vst.msk [vmem:[#allocation2 + $0x20] sm:$0xff] %vm454_vm2, %v424_v45  ;;  %v411_v53 = vadd.f32 %v410_v50, %v272_v31  ;;  %v427_v54 = vadd.f32 %v426_v51, %v292_v34 }
 0x103   : > { %458 = vst.msk [vmem:[#allocation2 + $0x18] sm:$0xff] %vm454_vm2, %v419_v48  ;;  %462 = vst.msk [vmem:[#allocation2 + $0x38] sm:$0xff] %vm454_vm2, %v435_v49 }
 0x104   : > { %456 = vst.msk [vmem:[#allocation2 + $0x8] sm:$0xff] %vm454_vm2, %v411_v53  ;;  %460 = vst.msk [vmem:[#allocation2 + $0x28] sm:$0xff] %vm454_vm2, %v427_v54 }
 0x106   : > { %v866_v56 = vpop.f32.mrb[4].mxu1 }
 0x107   : > { %v448_v57 = vadd.f32 %v866_v56, %v317_v55  ;;  %v439_v58 = vpop.f32.mrb[5].mxu1 }
 0x108   : > { %v440_v60 = vadd.f32 %v439_v58, %v307_v37  ;;  %v867_v61 = vpop.f32.mrb[6].mxu1 }
 0x109   : > { %465 = vst.msk [vmem:[#allocation2 + $0x50] sm:$0xff] %vm454_vm2, %v448_v57  ;;  %v451_v62 = vadd.f32 %v867_v61, %v322_v59  ;;  %v442_v63 = vpop.f32.mrb[7].mxu1 }
 0x10a   : > { %463 = vst.msk [vmem:[#allocation2 + $0x40] sm:$0xff] %vm454_vm2, %v440_v60  ;;  %v443_v0 = vadd.f32 %v442_v63, %v312_v52 }
 0x10b   : > { %466 = vst.msk [vmem:[#allocation2 + $0x58] sm:$0xff] %vm454_vm2, %v451_v62 }
 0x10c   : > { %464 = vst.msk [vmem:[#allocation2 + $0x48] sm:$0xff] %vm454_vm2, %v443_v0 }
 0x10d LB: >> { %v965_v1 = vmov 0.0   ;;  %vm966_vm3 = vmmov 0   ;;  %s821_s27 = sshll.u32 %s961_s0, 3  ;;  %vm509_vm4 = vcmask 1043456   ;;  %vm505_vm5 = vcmask 64512   ;;  %s476_s0 = sadd.s32 1, %s961_s0   ;;  %s961_s0 = sphi %s1104_s0, %s476_s0  }
 0x10e   : >> { %868 = vmatprep.subr.bf16.mxu0 %v965_v1  ;;  %870 = vmatprep.mubr.msk.bf16.mxu0 %vm966_vm3, %v965_v1  ;;  %s1112_s28 = scalar_lea.vmem [#allocation2], %s821_s27  ;;  %s625_s29 = scalar_lea.vmem [#allocation3], %s821_s27 }
 0x10f   : >> { %874 = vmatprep.subr.bf16.mxu1 %v965_v1  ;;  %876 = vmatprep.mubr.msk.bf16.mxu1 %vm966_vm3, %v965_v1  ;;  %p473_p9 = scmp.ge.s32.totalorder %s476_s0, 4  }
 0x110   : > { %930 = vset.pattern.permute.xlu1 (%p473_p9), %v964_v2  ;;  %v931_v48 = vld [vmem:[%s1170_s4] sm:$0xff] (%p473_p9)   ;;  %v639_v49 = vld [vmem:[%s1171_s5 + $0x10] sm:$0xff] (%p473_p9)  ;;  %v932_v50 = vld [vmem:[%s1170_s4 + $0x8] sm:$0xff] (%p473_p9)  }
 0x111   : > { %v637_v28 = vld [vmem:[%s1171_s5] sm:$0xff] (%p473_p9)  ;;  %v638_v51 = vld [vmem:[%s1171_s5 + $0x8] sm:$0xff] (%p473_p9) }
 0x113   : >> { %v479_v3 = vld [vmem:[%s1112_s28] sm:$0xff] }
 0x114   : >> { %v823_v4 = vld [vmem:[%s1112_s28 + $0x20] sm:$0xff]  ;;  %v480_v5 = vpack.c.bf16 %v479_v3, %v479_v3 }
 0x115   : >> { %v484_v6 = vpack.c.bf16 %v823_v4, %v823_v4  ;;  %v825_v36 = vld [vmem:[%s1112_s28 + $0x40] sm:$0xff] }
 0x116   : >> { %489 = vxpose.xlu0.c.b16.start.end [1/1] (short) (narrow) %v480_v5, 16  ;;  %v488_v37 = vpack.c.bf16 %v825_v36, %v825_v36 }
 0x117   : >> { %v511_v7 = vsel %vm509_vm4, %v484_v6, 0 }
 0x118   : >> { %869 = vmatpush3.bf16.msra.mxu0 %v511_v7 }
 0x11f   : > { %929 = vset.pattern.permute.xlu0 (%p473_p9), %v964_v2  ;;  %v640_v2 = vld [vmem:[%s1171_s5 + $0x18] sm:$0xff] (%p473_p9) }
 0x17c   : >> { %v497_v8 = vpop.trf.xlu0 }
 0x17d   : >> { %871 = vmatmul.mubr.msk.bf16.vlgmr.msra.gmra.mrb[0].mxu0 %vm505_vm5, %v497_v8 }
 0x17e   : > { %884 = vmatprep.mubr.msk.bf16.mxu0 (%p473_p9), %vm354_vm0, %v931_v48 }
 0x250   : >> { %v547_v9 = vpop.f32.mrb[0].mxu0 }
 0x251   : >> { %v554_v10 = vsel %vm1088_vm1, %v547_v9, -10000.0  ;;  %v872_v11 = vpop.f32.mrb[1].mxu0 }
 0x252   : >> { %v550_v12 = vpop.f32.mrb[2].mxu0  ;;  %v556_v13 = vsel %vm454_vm2, %v554_v10, -inf }
 0x253   : >> { %v555_v14 = vsel %vm1088_vm1, %v550_v12, -10000.0  ;;  %557 = vmax.xlane.f32.xlu0 %v556_v13  ;;  %v873_v15 = vpop.f32.mrb[3].mxu0 }
 0x254   : >> { %v559_v16 = vsel %vm454_vm2, %v555_v14, -inf }
 0x255   : >> { %560 = vmax.xlane.f32.xlu1 %v559_v16 }
 0x269   : > { %643 = vperm.xlu0 (%p473_p9), %929, %v637_v28  }
 0x26d   : > { %648 = vperm.xlu0 (%p473_p9), %929, %v638_v51  }
 0x2e0   : >> { %v558_v17 = vpop.xlane.xlu0 %557 }
 0x2e1   : >> { %v562_v18 = vsub.f32 %v554_v10, %v558_v17 }
 0x2e2   : >> { %v561_v19 = vpop.xlane.xlu1 %560 }
 0x2e3   : >> { %v564_v20 = vmul.f32 1.442695, %v562_v18  ;;  %v563_v21 = vsub.f32 %v555_v14, %v561_v19 }
 0x2e5   : >> { %921 = vpow2.f32 %v564_v20  ;;  %v566_v22 = vmul.f32 1.442695, %v563_v21 }
 0x2e7   : >> { %923 = vpow2.f32 %v566_v22 }
 0x2e8   : > { %v644_v53 = vpop.permute.xlu0 (%p473_p9), %643 }
 0x2ec   : > { %v649_v60 = vpop.permute.xlu0 (%p473_p9), %648 }
 0x2ef   : >> { %v922_v23 = vpop.eup %921 }
 0x2f0   : >> { %v568_v24 = vsel %vm454_vm2, %v922_v23, 0.0 }
 0x2f1   : >> { %v924_v25 = vpop.eup %923  ;;  %569 = vadd.xlane.f32.xlu1 %v568_v24 }
 0x2f2   : >> { %v571_v26 = vsel %vm454_vm2, %v924_v25, 0.0 }
 0x2f5   : >> { %572 = vadd.xlane.f32.xlu1 %v571_v26 }
 0x306   : > { %653 = vperm.xlu1 (%p473_p9), %930, %v639_v49  }
 0x30a   : > { %658 = vperm.xlu1 (%p473_p9), %930, %v640_v2  }
 0x37e   : >> { %v570_v27 = vpop.xlane.xlu1 %569 }
 0x37f   : >> { %925 = vrcp.f32 %v570_v27 }
 0x382   : >> { %v573_v29 = vpop.xlane.xlu1 %572 }
 0x383   : >> { %927 = vrcp.f32 %v573_v29 }
 0x386   : > { %v654_v52 = vpop.permute.xlu1 (%p473_p9), %653 }
 0x389   : >> { %v926_v30 = vpop.eup %925 }
 0x38a   : >> { %v576_v32 = vmul.f32 %v926_v30, %v922_v23  ;;  %v659_v57 = vpop.permute.xlu1 (%p473_p9), %658 }
 0x38d   : >> { %v928_v31 = vpop.eup %927 }
 0x38e   : >> { %v577_v33 = vmul.f32 %v928_v31, %v924_v25 }
 0x390   : >> { %v578_v34 = vpack.c.bf16 %v577_v33, %v576_v32 }
 0x392   : >> { %v583_v35 = vsel %vm454_vm2, %v578_v34, 0 }
 0x393   : >> { %875 = vmatpush3.bf16.xpose.msra.mxu1 %v583_v35 }
 0x39a   : >> { %877 = vmatmul.mubr.msk.bf16.vlgmr.msra.gmra.mrb[0].mxu1 %vm454_vm2, %v488_v37 }
 0x46a   : > { %475 = sbr.rel (!%p473_p9) target bundleno = 269 (0x10d), region = 81 }
 0x46d   : >> { %v619_v38 = vpop.f32.mrb[0].mxu1 }
 0x46e   : >> { %626 = vst.msk [vmem:[%s625_s29] sm:$0xff] %vm454_vm2, %v619_v38  ;;  %v878_v39 = vpop.f32.mrb[1].mxu1 }
 0x46f   : >> { %v622_v40 = vpop.f32.mrb[2].mxu1 }
 0x470   : >> { %v879_v41 = vpop.f32.mrb[3].mxu1 }
 0x475   : > { %v631_v42 = vld [vmem:[#allocation3] sm:$0xff]  ;;  %v632_v43 = vld [vmem:[#allocation3 + $0x8] sm:$0xff]  ;;  %v633_v44 = vld [vmem:[#allocation3 + $0x10] sm:$0xff] }
 0x476   : > { %v635_v45 = vpack.c.bf16 %v632_v43, %v631_v42  ;;  %v634_v46 = vld [vmem:[#allocation3 + $0x18] sm:$0xff] }
 0x477   : > { %v636_v47 = vpack.c.bf16 %v634_v46, %v633_v44 }
 0x478   : > { %880 = vmatprep.subr.bf16.mxu0 %v635_v45 }
 0x479   : > { %881 = vmatpush3.bf16.msra.mxu0 %v635_v45 }
 0x47a   : > { %882 = vmatprep.subr.bf16.mxu0 %v636_v47 }
 0x47d   : > { %883 = vmatpush3.bf16.msra.mxu0 %v636_v47 }
 0x480   : > { %885 = vmatmul.mubr.msk.bf16.vlgmr.msra.gmra.mrb[0].mxu0 %vm354_vm0, %v932_v50 }
 0x553   : > { %v886_v54 = vpop.f32.mrb[0].mxu0 }
 0x554   : > { %v720_v55 = vadd.f32 %v886_v54, %v654_v52  ;;  %v711_v56 = vpop.f32.mrb[1].mxu0 }
 0x555   : > { %v712_v58 = vadd.f32 %v711_v56, %v644_v53  ;;  %v887_v59 = vpop.f32.mrb[2].mxu0 }
 0x556   : > { %728 = vst.msk [vmem:[%s1032_s14 + $0x10] sm:$0xff] %vm454_vm2, %v720_v55  ;;  %v723_v61 = vadd.f32 %v887_v59, %v659_v57  ;;  %v714_v62 = vpop.f32.mrb[3].mxu0 }
 0x557   : > { %726 = vst.msk [vmem:[%s1032_s14] sm:$0xff] %vm454_vm2, %v712_v58  ;;  %v715_v63 = vadd.f32 %v714_v62, %v649_v60 }
 0x558   : > { %729 = vst.msk [vmem:[%s1032_s14 + $0x18] sm:$0xff] %vm454_vm2, %v723_v61 }
 0x559   : > { %727 = vst.msk [vmem:[%s1032_s14 + $0x8] sm:$0xff] %vm454_vm2, %v715_v63 }
 0x55a PF: > { %s22_s26 = sadd.s32 1, %s957_s26  }
 0x55b   : > { %p19_p10 = scmp.ge.s32.totalorder %s22_s26, 4  }
 0x55d   :  { %21 = sbr.rel (!%p19_p10) target bundleno = 16 (0x10), region = 92 }

</bundles_post_ra>
